<compile_context>
chip_gen: v7x
topology: tpu7x:2x2x1
jax: 0.10.0
libtpu: 0.0.40
codegen_flags: <defaults>
</compile_context>

<pallas_src>
import jax
import jax.numpy as jnp
from jax.experimental import pallas as pl
from jax.experimental.pallas import tpu as pltpu


def _normalize_kernel(scale_ref, bias_ref, x_ref, o_ref):
    # scale_ref / bias_ref: (rows_blk, 1) f32, one scalar per flattened (n, c) row.
    # x_ref / o_ref:        (rows_blk, cols_blk) tiles of the flattened image.
    xf = x_ref[...].astype(jnp.float32)
    o_ref[...] = (xf * scale_ref[...] + bias_ref[...]).astype(o_ref.dtype)


def _sublane_align(itemsize):
    # Native packed-sublane row counts: 8 for 4-byte, 16 for 2-byte, 32 for 1-byte.
    if itemsize >= 4:
        return 8
    if itemsize == 2:
        return 16
    return 32


def normalize_by_channel_mean_std(x, mean, std):
    """x: (N, C, H, W); mean, std: (C,). Returns (x - mean[None,:,None,None]) / std[...]."""
    N, C, H, W = x.shape
    rows, cols = N * C, H * W

    in_dtype = x.dtype
    # Integer inputs must not be truncated back to int on output.
    out_dtype = in_dtype if jnp.issubdtype(in_dtype, jnp.floating) else jnp.float32

    # Per-channel scale/bias in f32, replicated per flattened row
    # (row r of the (N*C, H*W) view has channel r % C).
    scale_c = 1.0 / std.astype(jnp.float32)
    bias_c = -mean.astype(jnp.float32) * scale_c
    scale_rows = jnp.tile(scale_c, N).reshape(rows, 1)
    bias_rows = jnp.tile(bias_c, N).reshape(rows, 1)

    x2 = x.reshape(rows, cols)

    in_item = jnp.dtype(in_dtype).itemsize
    out_item = jnp.dtype(out_dtype).itemsize
    align = _sublane_align(min(in_item, out_item))

    # --- block sizing ------------------------------------------------------
    # Lane axis: multiple of 128 (or the full extent when cols < 128).
    if cols <= 128:
        cols_blk = cols
    else:
        cols_blk = min((cols // 128) * 128, 8192)

    # Sublane axis: sized from the true bytes moved per grid step
    # (in tile + out tile + the two lane-padded (rows_blk, 128) f32 scale/bias tiles).
    step_budget = 12 * 1024 * 1024
    bytes_per_row = cols_blk * (in_item + out_item) + 2 * 128 * 4
    max_rows = max(align, step_budget // bytes_per_row)
    if rows <= max_rows:
        rows_blk = rows                                   # full extent: always legal
    else:
        rows_blk = max(align, (max_rows // align) * align)

    grid_r = pl.cdiv(rows, rows_blk)
    grid_c = pl.cdiv(cols, cols_blk)

    # v7x has 2 TensorCores and both grid axes are "parallel": make sure there are
    # at least 2 grid steps to shard across them whenever the shape allows it.
    if grid_r * grid_c < 2:
        if cols_blk > 128:
            cols_blk = max(128, ((cols_blk // 2) // 128) * 128)
        elif rows_blk > align:
            rows_blk = max(align, ((rows_blk // 2) // align) * align)
        grid_r = pl.cdiv(rows, rows_blk)
        grid_c = pl.cdiv(cols, cols_blk)

    cost = pl.CostEstimate(
        flops=2 * rows * cols,
        transcendentals=0,
        bytes_accessed=rows * cols * (in_item + out_item) + 2 * rows * 4,
    )

    # NOTE: input_output_aliases={2: 0} would halve peak HBM footprint when the
    # caller donates x, but x may be reused (adv-training re-reads the raw image)
    # and integer inputs change the output dtype, so it is intentionally omitted.
    out2 = pl.pallas_call(
        _normalize_kernel,
        out_shape=jax.ShapeDtypeStruct((rows, cols), out_dtype),
        grid_spec=pltpu.PrefetchScalarGridSpec(
            num_scalar_prefetch=0,
            # Invariant: column axis is innermost so the scale/bias block index
            # (r, 0) is constant across it and those tiles are fetched once per
            # row block, not once per step.
            grid=(grid_r, grid_c),
            in_specs=[
                pl.BlockSpec((rows_blk, 1), lambda r, c: (r, 0)),
                pl.BlockSpec((rows_blk, 1), lambda r, c: (r, 0)),
                pl.BlockSpec((rows_blk, cols_blk), lambda r, c: (r, c)),
            ],
            out_specs=pl.BlockSpec((rows_blk, cols_blk), lambda r, c: (r, c)),
        ),
        compiler_params=pltpu.CompilerParams(
            dimension_semantics=("parallel", "parallel"),
            vmem_limit_bytes=48 * 1024 * 1024,
        ),
        cost_estimate=cost,
    )(scale_rows, bias_rows, x2)

    return out2.reshape(N, C, H, W)


if __name__ == "__main__":
    # Deterministic "buffers" (module __init__ takes mean/std of shape (C,)).
    C = 4
    mean = jnp.array([0.485, 0.456, 0.406, 0.5], dtype=jnp.float32)
    std = jnp.array([0.229, 0.224, 0.225, 0.25], dtype=jnp.float32)

    # Deterministic input, NCHW like the PyTorch module expects.
    key = jax.random.PRNGKey(0)
    x = jax.random.uniform(key, (2, C, 16, 16), dtype=jnp.float32)

    out = normalize_by_channel_mean_std(x, mean, std)
    out = jax.block_until_ready(out)

    ref = (x - mean[None, :, None, None]) / std[None, :, None, None]
    assert out.shape == x.shape and out.dtype == x.dtype
    assert jnp.allclose(out, ref, atol=1e-5, rtol=1e-5)

    # Ragged-shape check: exercises the cdiv grid + masked edge block path
    # (cols = 150 is not a multiple of 128).
    mean3 = mean[:3]
    std3 = std[:3]
    x_odd = jax.random.uniform(jax.random.PRNGKey(0), (2, 3, 10, 15), dtype=jnp.float32)
    out_odd = jax.block_until_ready(normalize_by_channel_mean_std(x_odd, mean3, std3))
    ref_odd = (x_odd - mean3[None, :, None, None]) / std3[None, :, None, None]
    assert jnp.allclose(out_odd, ref_odd, atol=1e-5, rtol=1e-5)

    print("KERNEL_OK")
</pallas_src>

<mosaic_0001>
module attributes {stable_mosaic.version = 11 : i64} {
  func.func @_normalize_kernel(%arg0: i32, %arg1: i32, %arg2: memref<8x1xf32, #tpu.memory_space<vmem>>, %arg3: memref<8x1xf32, #tpu.memory_space<vmem>>, %arg4: memref<8x128xf32, #tpu.memory_space<vmem>>, %arg5: memref<8x128xf32, #tpu.memory_space<vmem>>) attributes {dimension_semantics = [#tpu.dimension_semantics<parallel>, #tpu.dimension_semantics<parallel>], iteration_bounds = array<i64: 1, 2>, scalar_prefetch = 0 : i64, scratch_operands = 0 : i64, tpu.core_type = #tpu.core_type<tc>, window_params = [{transform_indices = @transform_0, window_bounds = array<i64: 8, 1>}, {transform_indices = @transform_1, window_bounds = array<i64: 8, 1>}, {transform_indices = @transform_2, window_bounds = array<i64: 8, 128>}, {transform_indices = @transform_3, window_bounds = array<i64: 8, 128>}]} {
    %c0 = arith.constant 0 : index
    %c0_0 = arith.constant 0 : index
    %0 = vector.load %arg4[%c0, %c0_0] : memref<8x128xf32, #tpu.memory_space<vmem>>, vector<8x128xf32>
    %c0_1 = arith.constant 0 : index
    %c0_2 = arith.constant 0 : index
    %1 = vector.load %arg2[%c0_1, %c0_2] : memref<8x1xf32, #tpu.memory_space<vmem>>, vector<8x1xf32>
    %2 = vector.broadcast %1 : vector<8x1xf32> to vector<8x128xf32>
    %3 = arith.mulf %0, %2 : vector<8x128xf32>
    %c0_3 = arith.constant 0 : index
    %c0_4 = arith.constant 0 : index
    %4 = vector.load %arg3[%c0_3, %c0_4] : memref<8x1xf32, #tpu.memory_space<vmem>>, vector<8x1xf32>
    %5 = vector.broadcast %4 : vector<8x1xf32> to vector<8x128xf32>
    %6 = arith.addf %3, %5 : vector<8x128xf32>
    %c0_5 = arith.constant 0 : index
    %c0_6 = arith.constant 0 : index
    %7 = vector.load %arg5[%c0_5, %c0_6] : memref<8x128xf32, #tpu.memory_space<vmem>>, vector<8x128xf32>
    tpu.vector_store %arg5[%c0_5, %c0_6], %6 {strides = array<i32>} : memref<8x128xf32, #tpu.memory_space<vmem>>, vector<8x128xf32>,
    return
  }
  func.func @transform_0(%arg0: i32, %arg1: i32) -> (i32, i32) {
    %c0_i32 = arith.constant 0 : i32
    %c0_i32_0 = arith.constant 0 : i32
    return %arg0, %c0_i32 : i32, i32
  }
  func.func @transform_1(%arg0: i32, %arg1: i32) -> (i32, i32) {
    %c0_i32 = arith.constant 0 : i32
    %c0_i32_0 = arith.constant 0 : i32
    return %arg0, %c0_i32 : i32, i32
  }
  func.func @transform_2(%arg0: i32, %arg1: i32) -> (i32, i32) {
    %c0_i32 = arith.constant 0 : i32
    return %arg0, %arg1 : i32, i32
  }
  func.func @transform_3(%arg0: i32, %arg1: i32) -> (i32, i32) {
    %c0_i32 = arith.constant 0 : i32
    return %arg0, %arg1 : i32, i32
  }
}

</mosaic_0001>

<bundles_post_ra>
// kernel: tpu_custom_call.1
= control target key start
LH: loop header
LB: loop body
LE: loop exit
PB: predicated region body
PF: predicated region fallthrough
CT: control target
= control target key end

     0   :  { %8 = vsyncpa [#allocation3], 0  ;;  %s655_s0 = inlined_call_operand.vmem [shape: f32[8,1], index: 0, kind: input, shape index: {}]   ;;  %s656_s1 = inlined_call_operand.vmem [shape: f32[8,1], index: 1, kind: input, shape index: {}]   ;;  %s657_s2 = inlined_call_operand.vmem [shape: f32[8,256], index: 2, kind: input, shape index: {}]   ;;  %s658_s3 = inlined_call_operand.hbm [shape: f32[8,256], index: 3, kind: output, shape index: {}]  }
   0x1   :  { %10 = vsyncpa [#allocation3 + $0x1], 0  ;;  %s537_s12 = smov 0   ;;  %s539_s13 = smov 0  }
   0x2   :  { %s541_s14 = smov 0   ;;  %s543_s15 = smov 0  }
   0x3   :  { %s545_s16 = smov 0   ;;  %s547_s17 = smov 0  }
   0x4 LB: > { %s365_s18 = sadd.s32 4294967295, %s513_s17   ;;  %s366_s19 = sadd.s32 4294967294, %s513_s17   ;;  %s513_s17 = sphi %s547_s17, %s16_s17   ;;  %s509_s16 = sphi %s545_s16, %s665_s16   ;;  %s505_s15 = sphi %s543_s15, %s664_s15   ;;  %s501_s14 = sphi %s541_s14, %s663_s14   ;;  %s497_s13 = sphi %s539_s13, %s662_s13   ;;  %s493_s12 = sphi %s537_s12, %s661_s12  }
   0x5   : > { %s25_s20 = sadd.s32 1, %s509_s16  ;;  %s117_s21 = sadd.s32 1, %s501_s14 }
   0x6   : > { %p26_p0 = scmp.ge.s32.totalorder %s25_s20, 2  ;;  %p127_p1 = scmp.ne.s32.totalorder %s501_s14, %s497_s13 }
   0x7   : > { %p128_p2 = scmp.eq.s32.totalorder %s365_s18, 1  ;;  %p133_p3 = scmp.ne.s32.totalorder %s497_s13, %s493_s12 }
   0x8   : > { %s667_s20 = smov (%p26_p0, %s25_s20), 0  ;;  %p134_p5 = scmp.eq.s32.totalorder %s366_s19, 1 }
   0x9   : > { %p577_p4 = por %p128_p2, %p127_p1  ;;  %s113_s23 = ssub.s32 %s509_s16, %s667_s20 }
   0xa   : > { %p371_p6 = scmp.ge.s32.totalorder %s513_s17, 1  ;;  %p115_p7 = scmp.eq.s32.totalorder %s113_s23, 0 }
   0xb   : > { %p584_p8 = por %p134_p5, %p133_p3  ;;  %p177_p9 = scmp.lt.s32.totalorder %s513_s17, 3 }
   0xc   : > { %s590_s25 = scalar_select %p115_p7, %s501_s14, %s117_s21  }
   0xd   : > { %p178_p10 = pnand %p371_p6, %p177_p9 }
   0xe   : > { %v229_v0 = vld [vmem:[%s655_s0] sm:$0xff] (!%p178_p10)  ;;  %v515_v1 = vmov (!%p178_p10), 0   ;;  %p222_p11 = scmp.lt.s32.totalorder (!%p178_p10), %s505_s15, 1  ;;  %s209_s4 = sand.u32 (!%p178_p10), 1, %s497_s13  }
   0xf   : > { %181 = sbr.rel (%p178_p10) target bundleno = 164 (0xa4), region = 32  ;;  %434 = vset.pattern.permute.xlu0 (!%p178_p10), %v515_v1  ;;  %v236_v2 = vld [vmem:[%s656_s1] sm:$0xff] (!%p178_p10)  ;;  %s372_s6 = sshll.u32 (!%p178_p10), %s209_s4, 3 }
  0x10   : > { %232 = vperm.xlu0 (!%p178_p10), %434, %v229_v0   ;;  %s375_s10 = sshll.u32 (!%p178_p10), %s505_s15, 7  ;;  %s211_s11 = scalar_lea.vmem (!%p178_p10), [#allocation2], %s372_s6 }
  0x11   : > { %s260_s18 = sshll.u32 (!%p178_p10), %s211_s11, 4  ;;  %s608_s23 = scalar_lea.hbm (!%p178_p10), %s658_s3, %s375_s10  ;;  %s610_s18 = int_to_ptr.vmem [resolvable:$true] %s260_s18 }
  0x12   : > { %s245_s26 = scalar_lea.sflag (!%p178_p10), [#allocation3], %s209_s4  ;;  %s435_s27 = scalar_lea.vmem (!%p178_p10), %s610_s18, 128 }
  0x13   : > { %p436_p12 = scmp.ne.s32.totalorder (!%p178_p10), %s610_s18, %s435_s27 }
  0x14   : > { %239 = vperm.xlu0 (!%p178_p10), %434, %v236_v2  }
  0x15   : > { %p437_p13 = pnand (!%p178_p10), %p436_p12, %p577_p4 }
  0x16   : > { %s223_s30 = scalar_select %p222_p11, %s505_s15, 1 }
  0x17   : > { %p438_p0 = pneg %p437_p13  ;;  %s516_s15 = smov [#allocation2]  }
  0x18   : > { %s373_s5 = sshll.u32 %s223_s30, 3  ;;  %s439_s28 = sshll.u32 %s516_s15, 4  ;;  %s440_s28 = int_to_ptr.vmem [resolvable:$false] %s439_s28 }
  0x19   : > { %s227_s9 = scalar_lea.vmem %s657_s2, %s373_s5  ;;  %s441_s29 = scalar_lea.vmem %s440_s28, 256 }
  0x1a   : > { %v228_v4 = vld [vmem:[%s227_s9] sm:$0xff]  ;;  %p442_p1 = scmp.lt.s32.totalorder %s610_s18, %s440_s28  ;;  %p443_p2 = scmp.lt.s32.totalorder %s441_s29, %s435_s27 }
  0x1c   : > { %p444_p3 = por %p443_p2, %p442_p1 }
  0x1e   : > { %p445_p5 = pnand %p444_p3, %p438_p0 }
  0x8f   : > { %v233_v3 = vpop.permute.xlu0 %232 }
  0x90   : > { %v235_v5 = vmul.f32 %v233_v3, %v228_v4 }
  0x93   : > { %v240_v6 = vpop.permute.xlu0 %239 }
  0x94   : > { %v242_v7 = vadd.f32 %v240_v6, %v235_v5 }
  0x96   : > { %243 = vst [vmem:[%s211_s11] sm:$0xff] %v242_v7 }
  0x97   : > { %448 = shalt.err (!%p445_p5)
}
  0x98   : > { %s449_s30 = scalar_lea.hbm %s608_s23, 128  ;;  %s453_s6 = scalar_lea.hbm %s658_s3, 256 }
  0x99   : > { %p450_p6 = scmp.ne.s32.totalorder %s608_s23, %s449_s30  ;;  %p454_p10 = scmp.lt.u32.totalorder %s608_s23, %s658_s3 }
  0x9a   : > { %p455_p11 = scmp.lt.u32.totalorder %s453_s6, %s449_s30  ;;  %p457_p13 = scmp.lt.u32.totalorder %s449_s30, %s608_s23 }
  0x9b   : > { %p451_p7 = pnand %p450_p6, %p577_p4 }
  0x9c   : > { %p456_p12 = por %p455_p11, %p454_p10 }
  0x9d   : > { %p452_p9 = pneg %p451_p7 }
  0x9e   : > { %p458_p0 = por %p457_p13, %p456_p12 }
  0xa0   : > { %p459_p1 = pnand %p458_p0, %p452_p9 }
  0xa2   : > { %462 = shalt.err (!%p459_p1)
}
  0xa3   : > { %378 = dma.vmem_to_hbm [thread:$0]  (%p577_p4), %s610_s18, 128, %s608_s23, %s245_s26  }
  0xa4 PF: > { %p384_p2 = scmp.ge.s32.totalorder %s513_s17, 2  ;;  %s272_s9 = sand.u32 1, %s493_s12  }
  0xa5   : > { %s273_s10 = scalar_lea.sflag [#allocation3], %s272_s9 }
  0xa6   : > { %p381_p3 = pnand %p384_p2, %p584_p8 }
  0xa8   : > { %488 = dma.done.wait (!%p381_p3), %s273_s10, 128  }
  0xa9   : > { %490 = vsyncadd (!%p381_p3), %s273_s10, 4294967168  ;;  %s16_s17 = sadd.s32 1, %s513_s17   ;;  %s661_s12 = smov %s497_s13 }
  0xaa   : > { %p13_p5 = scmp.ge.s32.totalorder %s16_s17, 4   ;;  %s662_s13 = smov %s501_s14 }
  0xab   : > { %s663_s14 = smov %s590_s25  ;;  %s664_s15 = smov %s509_s16 }
  0xac   : > { %s665_s16 = smov %s667_s20  ;;  %15 = sbr.rel (!%p13_p5) target bundleno = 4 (0x4), region = 73 }
  0xb3   :  { %278 = vsyncpa [#allocation3], 1 }
  0xb4   :  { %280 = vsyncpa [#allocation3 + $0x1], 1 }

</bundles_post_ra>
